<compile_context>
chip_gen: v7x
topology: tpu7x:2x2x1
jax: 0.10.0
libtpu: 0.0.40
codegen_flags: <defaults>
</compile_context>

<pallas_src>
import jax
import jax.numpy as jnp
from jax.experimental import pallas as pl
from jax.experimental.pallas import tpu as pltpu

IN_FEATURES = 32000
LANES = 128
KB = IN_FEATURES // LANES   # 250 lane-blocks along the reduction axis
DEFAULT_TM = 64             # rows per grid step: 2*64*128KiB ≈ 16 MiB x double-buffer
                            # fits v7x (64 MiB VMEM) and the 32 MiB scoped limit set below.


def _scorer_kernel(x_ref, w_ref, b_ref, o_ref):
    """Score TM full rows in one grid step.

    x_ref: VMEM (TM, KB, 128)  — TM input rows, full reduction axis (lane-aligned)
    w_ref: VMEM (1,  KB, 128)  — lane-dense weight, resident across the grid
    b_ref: SMEM (1,)           — bias scalar
    o_ref: VMEM (TM, 1)        — scores
    """
    # VPU elementwise multiply (f32 accumulate even if inputs are bf16).
    prod = x_ref[...].astype(jnp.float32) * w_ref[...].astype(jnp.float32)
    # Accumulate lane-aligned partials with VPU adds across the KB axis, then a
    # single cross-lane (XLU) reduce per output row.
    partial = jnp.sum(prod, axis=1)                      # (TM, 128)
    row_sum = jnp.sum(partial, axis=-1, keepdims=True)   # (TM, 1)
    o_ref[...] = (row_sum + b_ref[0]).astype(o_ref.dtype)


def prompt_scorer_head(x, weight, bias, *, block_m=DEFAULT_TM):
    """nn.Linear(32000, 1) forward: x @ weight.T + bias.

    x:      [M, 32000]
    weight: [1, 32000]   (PyTorch layout, kept lane-dense — no [K,1] reshape)
    bias:   [1]
    returns [M, 1]
    """
    M, K = x.shape
    assert K == IN_FEATURES and K % LANES == 0

    tm = min(block_m, M)
    grid_m = pl.cdiv(M, tm)

    # HBM-side reshapes of contiguous row-major data are free: split K into
    # lane-blocks so the in-kernel reduction is lane-aligned (no in-kernel
    # reshape / relayout).
    x3 = x.reshape(M, KB, LANES)
    w3 = weight.reshape(1, KB, LANES)
    b = bias.reshape(1).astype(jnp.float32)   # SMEM scalar

    cost = pl.CostEstimate(
        flops=2 * M * K,
        transcendentals=0,
        bytes_accessed=M * K * x.dtype.itemsize
        + K * weight.dtype.itemsize
        + M * 4,
    )

    return pl.pallas_call(
        _scorer_kernel,
        out_shape=jax.ShapeDtypeStruct((M, 1), x.dtype),
        grid_spec=pltpu.PrefetchScalarGridSpec(
            num_scalar_prefetch=0,
            grid=(grid_m,),
            in_specs=[
                # x rows for this grid step (only array streamed from HBM).
                pl.BlockSpec((tm, KB, LANES), lambda m: (m, 0, 0)),
                # Weight: constant index_map -> VMEM-resident across the grid.
                pl.BlockSpec((1, KB, LANES), lambda m: (0, 0, 0)),
                # Bias: single scalar in SMEM, no VMEM tile / per-step DMA.
                pl.BlockSpec(memory_space=pltpu.MemorySpace.SMEM),
            ],
            out_specs=pl.BlockSpec((tm, 1), lambda m: (m, 0)),
        ),
        compiler_params=pltpu.CompilerParams(
            # M rows are independent -> shard across TensorCores (v7x megacore).
            dimension_semantics=("parallel",),
            # ~17 MiB needed at TM=64/f32; 32 MiB is safe on v5e/v6e/v7x.
            vmem_limit_bytes=32 * 1024 * 1024,
        ),
        cost_estimate=cost,
    )(x3, w3, b)


if __name__ == "__main__":
    key = jax.random.PRNGKey(0)
    kx, kw, kb = jax.random.split(key, 3)

    batch = 2
    x = jax.random.normal(kx, (batch, IN_FEATURES), dtype=jnp.float32)

    # Deterministic PyTorch-style init: uniform(-1/sqrt(K), 1/sqrt(K)).
    bound = 1.0 / (IN_FEATURES ** 0.5)
    weight = jax.random.uniform(
        kw, (1, IN_FEATURES), minval=-bound, maxval=bound, dtype=jnp.float32
    )
    bias = jax.random.uniform(
        kb, (1,), minval=-bound, maxval=bound, dtype=jnp.float32
    )

    out = prompt_scorer_head(x, weight, bias)
    out = jax.block_until_ready(out)

    # Reference check in plain JAX (same math as nn.Linear(32000, 1)).
    ref = x @ weight.T + bias
    assert out.shape == (batch, 1)
    assert jnp.allclose(out, ref, atol=1e-3, rtol=1e-3)

    print("KERNEL_OK")
</pallas_src>

<mosaic_0001>
module attributes {stable_mosaic.version = 11 : i64} {
  func.func @_scorer_kernel(%arg0: i32, %arg1: memref<2x250x128xf32, #tpu.memory_space<vmem>>, %arg2: memref<1x250x128xf32, #tpu.memory_space<vmem>>, %arg3: memref<1xf32, #tpu.memory_space<smem>>, %arg4: memref<2x1xf32, #tpu.memory_space<vmem>>) attributes {dimension_semantics = [#tpu.dimension_semantics<parallel>], iteration_bounds = array<i64: 1>, scalar_prefetch = 0 : i64, scratch_operands = 0 : i64, tpu.core_type = #tpu.core_type<tc>, window_params = [{transform_indices = @transform_0, window_bounds = array<i64: 2, 250, 128>}, {pipeline_mode = #tpu.pipeline_mode<synchronous>, transform_indices = @transform_1, window_bounds = array<i64: 1, 250, 128>}, {transform_indices = @transform_2, window_bounds = array<i64: 1>}, {transform_indices = @transform_3, window_bounds = array<i64: 2, 1>}]} {
    %c0 = arith.constant 0 : index
    %c0_0 = arith.constant 0 : index
    %c0_1 = arith.constant 0 : index
    %0 = vector.load %arg1[%c0, %c0_0, %c0_1] : memref<2x250x128xf32, #tpu.memory_space<vmem>>, vector<2x250x128xf32>
    %c0_2 = arith.constant 0 : index
    %c0_3 = arith.constant 0 : index
    %c0_4 = arith.constant 0 : index
    %1 = vector.load %arg2[%c0_2, %c0_3, %c0_4] : memref<1x250x128xf32, #tpu.memory_space<vmem>>, vector<1x250x128xf32>
    %2 = vector.broadcast %1 : vector<1x250x128xf32> to vector<2x250x128xf32>
    %3 = arith.mulf %0, %2 : vector<2x250x128xf32>
    %cst = arith.constant dense<0.000000e+00> : vector<2x128xf32>
    %4 = vector.multi_reduction <add>, %3, %cst [1] : vector<2x250x128xf32> to vector<2x128xf32>
    %cst_5 = arith.constant dense<0.000000e+00> : vector<2xf32>
    %5 = vector.multi_reduction <add>, %4, %cst_5 [1] : vector<2x128xf32> to vector<2xf32>
    %6 = vector.shape_cast %5 : vector<2xf32> to vector<2x1xf32>
    %c0_6 = arith.constant 0 : index
    %7 = memref.load %arg3[%c0_6] : memref<1xf32, #tpu.memory_space<smem>>
    %8 = vector.broadcast %7 : f32 to vector<2x1xf32>
    %9 = arith.addf %6, %8 : vector<2x1xf32>
    %c0_7 = arith.constant 0 : index
    %c0_8 = arith.constant 0 : index
    %10 = vector.load %arg4[%c0_7, %c0_8] : memref<2x1xf32, #tpu.memory_space<vmem>>, vector<2x1xf32>
    tpu.vector_store %arg4[%c0_7, %c0_8], %9 {strides = array<i32>} : memref<2x1xf32, #tpu.memory_space<vmem>>, vector<2x1xf32>,
    return
  }
  func.func @transform_0(%arg0: i32) -> (i32, i32, i32) {
    %c0_i32 = arith.constant 0 : i32
    %c0_i32_0 = arith.constant 0 : i32
    %c0_i32_1 = arith.constant 0 : i32
    return %arg0, %c0_i32, %c0_i32_0 : i32, i32, i32
  }
  func.func @transform_1(%arg0: i32) -> (i32, i32, i32) {
    %c0_i32 = arith.constant 0 : i32
    %c0_i32_0 = arith.constant 0 : i32
    %c0_i32_1 = arith.constant 0 : i32
    %c0_i32_2 = arith.constant 0 : i32
    return %c0_i32, %c0_i32_0, %c0_i32_1 : i32, i32, i32
  }
  func.func @transform_2(%arg0: i32) -> i32 {
    %c0_i32 = arith.constant 0 : i32
    %c0_i32_0 = arith.constant 0 : i32
    return %c0_i32 : i32
  }
  func.func @transform_3(%arg0: i32) -> (i32, i32) {
    %c0_i32 = arith.constant 0 : i32
    %c0_i32_0 = arith.constant 0 : i32
    return %arg0, %c0_i32 : i32, i32
  }
}

</mosaic_0001>

<bundles_post_ra>
// kernel: tpu_custom_call.1
= control target key start
LH: loop header
LB: loop body
LE: loop exit
PB: predicated region body
PF: predicated region fallthrough
CT: control target
= control target key end

     0   :  { %vm205_vm0 = vcmask 1041408   ;;  %vm254_vm1 = vcmask 1041409   ;;  %vm263_vm2 = vcmask 1024   ;;  %s586_s0 = inlined_call_operand.vmem [shape: f32[2,250,128], index: 0, kind: input, shape index: {}]   ;;  %s587_s1 = inlined_call_operand.vmem [shape: f32[1,250,128], index: 1, kind: input, shape index: {}]   ;;  %s588_s2 = inlined_call_operand.<no memory space> [shape: f32[1], index: 2, kind: input, shape index: {}]   ;;  %s589_s3 = inlined_call_operand.vmem [shape: f32[2,1], index: 3, kind: output, shape index: {}]  }
   0x1   :  { %v15_v0 = vld [vmem:[%s586_s0] sm:$0xff]  ;;  %v16_v1 = vld [vmem:[%s586_s0 + $0x8] sm:$0xff]  ;;  %v17_v6 = vld [vmem:[%s586_s0 + $0x10] sm:$0xff] }
   0x2   :  { %v47_v2 = vld [vmem:[%s586_s0 + $0x100] sm:$0xff]  ;;  %v48_v3 = vld [vmem:[%s586_s0 + $0x108] sm:$0xff]  ;;  %v49_v7 = vld [vmem:[%s586_s0 + $0x110] sm:$0xff] }
   0x3   :  { %v79_v4 = vld [vmem:[%s587_s1] sm:$0xff]  ;;  %v80_v5 = vld [vmem:[%s587_s1 + $0x8] sm:$0xff]  ;;  %v81_v8 = vld [vmem:[%s587_s1 + $0x10] sm:$0xff] }
   0x4   :  { %v111_v9 = vmul.f32 %v79_v4, %v15_v0  ;;  %v112_v10 = vmul.f32 %v80_v5, %v16_v1  ;;  %v143_v11 = vmul.f32 %v79_v4, %v47_v2  ;;  %v144_v12 = vmul.f32 %v80_v5, %v48_v3  ;;  %v18_v13 = vld [vmem:[%s586_s0 + $0x18] sm:$0xff]  ;;  %v19_v18 = vld [vmem:[%s586_s0 + $0x20] sm:$0xff]  ;;  %v20_v25 = vld [vmem:[%s586_s0 + $0x28] sm:$0xff] }
   0x5   :  { %v50_v14 = vld [vmem:[%s586_s0 + $0x118] sm:$0xff]  ;;  %v113_v16 = vmul.f32 %v81_v8, %v17_v6  ;;  %v145_v17 = vmul.f32 %v81_v8, %v49_v7  ;;  %v51_v19 = vld [vmem:[%s586_s0 + $0x120] sm:$0xff]  ;;  %v52_v26 = vld [vmem:[%s586_s0 + $0x128] sm:$0xff] }
   0x6   :  { %v82_v15 = vld [vmem:[%s587_s1 + $0x18] sm:$0xff]  ;;  %v83_v20 = vld [vmem:[%s587_s1 + $0x20] sm:$0xff]  ;;  %v175_v23 = vadd.f32 %v112_v10, %v111_v9  ;;  %v214_v24 = vadd.f32 %v144_v12, %v143_v11  ;;  %v84_v27 = vld [vmem:[%s587_s1 + $0x28] sm:$0xff] }
   0x7   :  { %v114_v21 = vmul.f32 %v82_v15, %v18_v13  ;;  %v146_v22 = vmul.f32 %v82_v15, %v50_v14  ;;  %v115_v28 = vmul.f32 %v83_v20, %v19_v18  ;;  %v147_v29 = vmul.f32 %v83_v20, %v51_v19  ;;  %v21_v32 = vld [vmem:[%s586_s0 + $0x30] sm:$0xff]  ;;  %v22_v39 = vld [vmem:[%s586_s0 + $0x38] sm:$0xff]  ;;  %v23_v46 = vld [vmem:[%s586_s0 + $0x40] sm:$0xff] }
   0x8   :  { %v176_v30 = vadd.f32 %v175_v23, %v113_v16  ;;  %v215_v31 = vadd.f32 %v214_v24, %v145_v17  ;;  %v53_v33 = vld [vmem:[%s586_s0 + $0x130] sm:$0xff]  ;;  %v116_v35 = vmul.f32 %v84_v27, %v20_v25  ;;  %v148_v36 = vmul.f32 %v84_v27, %v52_v26  ;;  %v54_v40 = vld [vmem:[%s586_s0 + $0x138] sm:$0xff]  ;;  %v55_v47 = vld [vmem:[%s586_s0 + $0x140] sm:$0xff] }
   0x9   :  { %v85_v34 = vld [vmem:[%s587_s1 + $0x30] sm:$0xff]  ;;  %v86_v41 = vld [vmem:[%s587_s1 + $0x38] sm:$0xff]  ;;  %v87_v48 = vld [vmem:[%s587_s1 + $0x40] sm:$0xff] }
   0xa   :  { %v177_v37 = vadd.f32 %v176_v30, %v114_v21  ;;  %v216_v38 = vadd.f32 %v215_v31, %v146_v22  ;;  %v117_v42 = vmul.f32 %v85_v34, %v21_v32  ;;  %v149_v43 = vmul.f32 %v85_v34, %v53_v33  ;;  %v24_v53 = vld [vmem:[%s586_s0 + $0x48] sm:$0xff]  ;;  %v25_v60 = vld [vmem:[%s586_s0 + $0x50] sm:$0xff]  ;;  %v26_v3 = vld [vmem:[%s586_s0 + $0x58] sm:$0xff] }
   0xb   :  { %v118_v49 = vmul.f32 %v86_v41, %v22_v39  ;;  %v150_v50 = vmul.f32 %v86_v41, %v54_v40  ;;  %v56_v54 = vld [vmem:[%s586_s0 + $0x148] sm:$0xff]  ;;  %v119_v56 = vmul.f32 %v87_v48, %v23_v46  ;;  %v151_v57 = vmul.f32 %v87_v48, %v55_v47  ;;  %v57_v61 = vld [vmem:[%s586_s0 + $0x150] sm:$0xff]  ;;  %v58_v4 = vld [vmem:[%s586_s0 + $0x158] sm:$0xff] }
   0xc   :  { %v178_v44 = vadd.f32 %v177_v37, %v115_v28  ;;  %v217_v45 = vadd.f32 %v216_v38, %v147_v29  ;;  %v88_v55 = vld [vmem:[%s587_s1 + $0x48] sm:$0xff]  ;;  %v89_v62 = vld [vmem:[%s587_s1 + $0x50] sm:$0xff]  ;;  %v90_v5 = vld [vmem:[%s587_s1 + $0x58] sm:$0xff] }
   0xd   :  { %v120_v63 = vmul.f32 %v88_v55, %v24_v53  ;;  %v152_v0 = vmul.f32 %v88_v55, %v56_v54  ;;  %v121_v6 = vmul.f32 %v89_v62, %v25_v60  ;;  %v153_v7 = vmul.f32 %v89_v62, %v57_v61  ;;  %v27_v10 = vld [vmem:[%s586_s0 + $0x60] sm:$0xff]  ;;  %v28_v17 = vld [vmem:[%s586_s0 + $0x68] sm:$0xff]  ;;  %v29_v24 = vld [vmem:[%s586_s0 + $0x70] sm:$0xff] }
   0xe   :  { %v179_v51 = vadd.f32 %v178_v44, %v116_v35  ;;  %v218_v52 = vadd.f32 %v217_v45, %v148_v36  ;;  %v59_v11 = vld [vmem:[%s586_s0 + $0x160] sm:$0xff]  ;;  %v122_v13 = vmul.f32 %v90_v5, %v26_v3  ;;  %v154_v14 = vmul.f32 %v90_v5, %v58_v4  ;;  %v60_v18 = vld [vmem:[%s586_s0 + $0x168] sm:$0xff]  ;;  %v61_v25 = vld [vmem:[%s586_s0 + $0x170] sm:$0xff] }
   0xf   :  { %v91_v12 = vld [vmem:[%s587_s1 + $0x60] sm:$0xff]  ;;  %v92_v19 = vld [vmem:[%s587_s1 + $0x68] sm:$0xff]  ;;  %v93_v26 = vld [vmem:[%s587_s1 + $0x70] sm:$0xff] }
  0x10   :  { %v180_v58 = vadd.f32 %v179_v51, %v117_v42  ;;  %v219_v59 = vadd.f32 %v218_v52, %v149_v43  ;;  %v123_v20 = vmul.f32 %v91_v12, %v27_v10  ;;  %v155_v21 = vmul.f32 %v91_v12, %v59_v11  ;;  %v30_v31 = vld [vmem:[%s586_s0 + $0x78] sm:$0xff]  ;;  %v31_v38 = vld [vmem:[%s586_s0 + $0x80] sm:$0xff]  ;;  %v32_v45 = vld [vmem:[%s586_s0 + $0x88] sm:$0xff] }
  0x11   :  { %v124_v27 = vmul.f32 %v92_v19, %v28_v17  ;;  %v156_v28 = vmul.f32 %v92_v19, %v60_v18  ;;  %v62_v32 = vld [vmem:[%s586_s0 + $0x178] sm:$0xff]  ;;  %v125_v34 = vmul.f32 %v93_v26, %v29_v24  ;;  %v157_v35 = vmul.f32 %v93_v26, %v61_v25  ;;  %v63_v39 = vld [vmem:[%s586_s0 + $0x180] sm:$0xff]  ;;  %v64_v46 = vld [vmem:[%s586_s0 + $0x188] sm:$0xff] }
  0x12   :  { %v181_v1 = vadd.f32 %v180_v58, %v118_v49  ;;  %v220_v2 = vadd.f32 %v219_v59, %v150_v50  ;;  %v94_v33 = vld [vmem:[%s587_s1 + $0x78] sm:$0xff]  ;;  %v95_v40 = vld [vmem:[%s587_s1 + $0x80] sm:$0xff]  ;;  %v96_v47 = vld [vmem:[%s587_s1 + $0x88] sm:$0xff] }
  0x13   :  { %v126_v41 = vmul.f32 %v94_v33, %v30_v31  ;;  %v158_v42 = vmul.f32 %v94_v33, %v62_v32  ;;  %v127_v48 = vmul.f32 %v95_v40, %v31_v38  ;;  %v159_v49 = vmul.f32 %v95_v40, %v63_v39  ;;  %v33_v52 = vld [vmem:[%s586_s0 + $0x90] sm:$0xff]  ;;  %v34_v59 = vld [vmem:[%s586_s0 + $0x98] sm:$0xff]  ;;  %v67_v3 = vld [vmem:[%s586_s0 + $0x1a0] sm:$0xff] }
  0x14   :  { %v182_v8 = vadd.f32 %v181_v1, %v119_v56  ;;  %v221_v9 = vadd.f32 %v220_v2, %v151_v57  ;;  %v65_v53 = vld [vmem:[%s586_s0 + $0x190] sm:$0xff]  ;;  %v128_v55 = vmul.f32 %v96_v47, %v32_v45  ;;  %v160_v56 = vmul.f32 %v96_v47, %v64_v46  ;;  %v66_v60 = vld [vmem:[%s586_s0 + $0x198] sm:$0xff]  ;;  %v35_v2 = vld [vmem:[%s586_s0 + $0xa0] sm:$0xff] }
  0x15   :  { %v97_v54 = vld [vmem:[%s587_s1 + $0x90] sm:$0xff]  ;;  %v98_v61 = vld [vmem:[%s587_s1 + $0x98] sm:$0xff]  ;;  %v99_v4 = vld [vmem:[%s587_s1 + $0xa0] sm:$0xff] }
  0x16   :  { %v183_v15 = vadd.f32 %v182_v8, %v120_v63  ;;  %v222_v16 = vadd.f32 %v221_v9, %v152_v0  ;;  %v129_v62 = vmul.f32 %v97_v54, %v33_v52  ;;  %v161_v63 = vmul.f32 %v97_v54, %v65_v53  ;;  %v36_v9 = vld [vmem:[%s586_s0 + $0xa8] sm:$0xff]  ;;  %v69_v17 = vld [vmem:[%s586_s0 + $0x1b0] sm:$0xff]  ;;  %v70_v24 = vld [vmem:[%s586_s0 + $0x1b8] sm:$0xff] }
  0x17   :  { %v130_v5 = vmul.f32 %v98_v61, %v34_v59  ;;  %v68_v10 = vld [vmem:[%s586_s0 + $0x1a8] sm:$0xff]  ;;  %v131_v12 = vmul.f32 %v99_v4, %v35_v2  ;;  %v101_v18 = vld [vmem:[%s587_s1 + $0xb0] sm:$0xff]  ;;  %v102_v25 = vld [vmem:[%s587_s1 + $0xb8] sm:$0xff] }
  0x18   :  { %v184_v22 = vadd.f32 %v183_v15, %v121_v6  ;;  %v223_v23 = vadd.f32 %v222_v16, %v153_v7  ;;  %v162_v6 = vmul.f32 %v98_v61, %v66_v60  ;;  %v100_v11 = vld [vmem:[%s587_s1 + $0xa8] sm:$0xff]  ;;  %v37_v16 = vld [vmem:[%s586_s0 + $0xb0] sm:$0xff]  ;;  %v71_v31 = vld [vmem:[%s586_s0 + $0x1c0] sm:$0xff] }
  0x19   :  { %v132_v19 = vmul.f32 %v100_v11, %v36_v9  ;;  %v133_v26 = vmul.f32 %v101_v18, %v37_v16  ;;  %v103_v32 = vld [vmem:[%s587_s1 + $0xc0] sm:$0xff]  ;;  %v72_v38 = vld [vmem:[%s586_s0 + $0x1c8] sm:$0xff]  ;;  %v73_v45 = vld [vmem:[%s586_s0 + $0x1d0] sm:$0xff] }
  0x1a   :  { %v185_v29 = vadd.f32 %v184_v22, %v122_v13  ;;  %v224_v30 = vadd.f32 %v223_v23, %v154_v14  ;;  %v163_v13 = vmul.f32 %v99_v4, %v67_v3  ;;  %v38_v23 = vld [vmem:[%s586_s0 + $0xb8] sm:$0xff]  ;;  %v104_v39 = vld [vmem:[%s587_s1 + $0xc8] sm:$0xff]  ;;  %v105_v46 = vld [vmem:[%s587_s1 + $0xd0] sm:$0xff] }
  0x1b   :  { %v134_v33 = vmul.f32 %v102_v25, %v38_v23  ;;  %v74_v52 = vld [vmem:[%s586_s0 + $0x1d8] sm:$0xff]  ;;  %v75_v59 = vld [vmem:[%s586_s0 + $0x1e0] sm:$0xff]  ;;  %v76_v2 = vld [vmem:[%s586_s0 + $0x1e8] sm:$0xff] }
  0x1c   :  { %v186_v36 = vadd.f32 %v185_v29, %v123_v20  ;;  %v225_v37 = vadd.f32 %v224_v30, %v155_v21  ;;  %v164_v20 = vmul.f32 %v100_v11, %v68_v10  ;;  %v39_v30 = vld [vmem:[%s586_s0 + $0xc0] sm:$0xff]  ;;  %v106_v53 = vld [vmem:[%s587_s1 + $0xd8] sm:$0xff]  ;;  %v108_v3 = vld [vmem:[%s587_s1 + $0xe8] sm:$0xff] }
  0x1d   :  { %v135_v40 = vmul.f32 %v103_v32, %v39_v30  ;;  %v107_v60 = vld [vmem:[%s587_s1 + $0xe0] sm:$0xff]  ;;  %v46_v4 = vld [vmem:[%s586_s0 + $0xf8] sm:$0x3]  ;;  %v45_v11 = vld [vmem:[%s586_s0 + $0xf0] sm:$0xff] }
  0x1e   :  { %v187_v43 = vadd.f32 %v186_v36, %v124_v27  ;;  %v226_v44 = vadd.f32 %v225_v37, %v156_v28  ;;  %v165_v27 = vmul.f32 %v101_v18, %v69_v17  ;;  %v40_v37 = vld [vmem:[%s586_s0 + $0xc8] sm:$0xff] }
  0x1f   :  { %v136_v47 = vmul.f32 %v104_v39, %v40_v37 }
  0x20   :  { %v188_v50 = vadd.f32 %v187_v43, %v125_v34  ;;  %v227_v51 = vadd.f32 %v226_v44, %v157_v35  ;;  %v166_v34 = vmul.f32 %v102_v25, %v70_v24  ;;  %v41_v44 = vld [vmem:[%s586_s0 + $0xd0] sm:$0xff] }
  0x21   :  { %v137_v54 = vmul.f32 %v105_v46, %v41_v44 }
  0x22   :  { %v189_v57 = vadd.f32 %v188_v50, %v126_v41  ;;  %v228_v58 = vadd.f32 %v227_v51, %v158_v42  ;;  %v167_v41 = vmul.f32 %v103_v32, %v71_v31  ;;  %v42_v51 = vld [vmem:[%s586_s0 + $0xd8] sm:$0xff] }
  0x23   :  { %v138_v61 = vmul.f32 %v106_v53, %v42_v51 }
  0x24   :  { %v190_v0 = vadd.f32 %v189_v57, %v127_v48  ;;  %v229_v1 = vadd.f32 %v228_v58, %v159_v49  ;;  %v168_v48 = vmul.f32 %v104_v39, %v72_v38  ;;  %v43_v58 = vld [vmem:[%s586_s0 + $0xe0] sm:$0xff] }
  0x26   :  { %v191_v7 = vadd.f32 %v190_v0, %v128_v55  ;;  %v230_v8 = vadd.f32 %v229_v1, %v160_v56  ;;  %v169_v55 = vmul.f32 %v105_v46, %v73_v45  ;;  %v44_v1 = vld [vmem:[%s586_s0 + $0xe8] sm:$0xff]  ;;  %v261_v46 = vstv %s588_s2 }
  0x28   :  { %v192_v14 = vadd.f32 %v191_v7, %v129_v62  ;;  %v231_v15 = vadd.f32 %v230_v8, %v161_v63  ;;  %v170_v62 = vmul.f32 %v106_v53, %v74_v52  ;;  %v139_v7 = vmul.f32 %v107_v60, %v43_v58 }
  0x29   :  { %v171_v8 = vmul.f32 %v107_v60, %v75_v59 }
  0x2a   :  { %v193_v21 = vadd.f32 %v192_v14, %v130_v5  ;;  %v232_v22 = vadd.f32 %v231_v15, %v162_v6  ;;  %v78_v5 = vld [vmem:[%s586_s0 + $0x1f8] sm:$0x3]  ;;  %v140_v14 = vmul.f32 %v108_v3, %v44_v1  ;;  %v172_v15 = vmul.f32 %v108_v3, %v76_v2 }
  0x2b   :  { %v110_v6 = vld [vmem:[%s587_s1 + $0xf8] sm:$0x3] }
  0x2c   :  { %v194_v28 = vadd.f32 %v193_v21, %v131_v12  ;;  %v233_v29 = vadd.f32 %v232_v22, %v163_v13  ;;  %v77_v12 = vld [vmem:[%s586_s0 + $0x1f0] sm:$0xff]  ;;  %v142_v18 = vmul.f32 %v110_v6, %v46_v4 }
  0x2d   :  { %v109_v13 = vld [vmem:[%s587_s1 + $0xf0] sm:$0xff] }
  0x2e   :  { %v195_v35 = vadd.f32 %v194_v28, %v132_v19  ;;  %v234_v36 = vadd.f32 %v233_v29, %v164_v20  ;;  %v174_v19 = vmul.f32 %v110_v6, %v78_v5  ;;  %v141_v20 = vmul.f32 %v109_v13, %v45_v11 }
  0x2f   :  { %v173_v21 = vmul.f32 %v109_v13, %v77_v12 }
  0x30   :  { %v196_v42 = vadd.f32 %v195_v35, %v133_v26  ;;  %v235_v43 = vadd.f32 %v234_v36, %v165_v27  ;;  %v206_v26 = vsel %vm205_vm0, %v142_v18, 0.0  ;;  %v244_v27 = vsel %vm205_vm0, %v174_v19, 0.0 }
  0x32   :  { %v197_v49 = vadd.f32 %v196_v42, %v134_v33  ;;  %v236_v50 = vadd.f32 %v235_v43, %v166_v34 }
  0x34   :  { %v198_v56 = vadd.f32 %v197_v49, %v135_v40  ;;  %v237_v57 = vadd.f32 %v236_v50, %v167_v41 }
  0x36   :  { %v199_v63 = vadd.f32 %v198_v56, %v136_v47  ;;  %v238_v0 = vadd.f32 %v237_v57, %v168_v48 }
  0x38   :  { %v200_v9 = vadd.f32 %v199_v63, %v137_v54  ;;  %v239_v10 = vadd.f32 %v238_v0, %v169_v55 }
  0x3a   :  { %v201_v16 = vadd.f32 %v200_v9, %v138_v61  ;;  %v240_v17 = vadd.f32 %v239_v10, %v170_v62 }
  0x3c   :  { %v202_v22 = vadd.f32 %v201_v16, %v139_v7  ;;  %v241_v23 = vadd.f32 %v240_v17, %v171_v8 }
  0x3e   :  { %v203_v24 = vadd.f32 %v202_v22, %v140_v14  ;;  %v242_v25 = vadd.f32 %v241_v23, %v172_v15 }
  0x40   :  { %v204_v28 = vadd.f32 %v203_v24, %v141_v20  ;;  %v243_v29 = vadd.f32 %v242_v25, %v173_v21 }
  0x42   :  { %v207_v30 = vadd.f32 %v206_v26, %v204_v28  ;;  %v245_v31 = vadd.f32 %v244_v27, %v243_v29 }
  0x44   :  { %v208_v32 = vrot.slane %v207_v30, 4  ;;  %v246_v33 = vrot.slane %v245_v31, 4 }
  0x46   :  { %v209_v34 = vadd.f32 %v208_v32, %v207_v30  ;;  %v247_v35 = vadd.f32 %v246_v33, %v245_v31 }
  0x48   :  { %v210_v36 = vrot.slane %v209_v34, 2  ;;  %v248_v37 = vrot.slane %v247_v35, 2 }
  0x4a   :  { %v211_v38 = vadd.f32 %v210_v36, %v209_v34  ;;  %v249_v39 = vadd.f32 %v248_v37, %v247_v35 }
  0x4c   :  { %v212_v40 = vrot.slane %v211_v38, 1  ;;  %v250_v41 = vrot.slane %v249_v39, 1 }
  0x4e   :  { %v213_v42 = vadd.f32 %v212_v40, %v211_v38  ;;  %v251_v43 = vadd.f32 %v250_v41, %v249_v39 }
  0x50   :  { %v255_v44 = vsel %vm254_vm1, %v251_v43, %v213_v42 }
  0x51   :  { %v257_v45 = vsel %vm205_vm0, %v255_v44, 0.0 }
  0x52   :  { %258 = vadd.xlane.f32.xlu0 %v257_v45 }
  0xdf   :  { %v259_v47 = vpop.xlane.xlu0 %258 }
  0xe0   :  { %v262_v48 = vadd.f32 %v261_v46, %v259_v47 }
  0xe2   :  { %264 = vst.msk [vmem:[%s589_s3] sm:$0x3] %vm263_vm2, %v262_v48 }

</bundles_post_ra>
